<compile_context>
chip_gen: v7x
topology: tpu7x:2x2x1
jax: 0.10.0
libtpu: 0.0.40
codegen_flags: <defaults>
</compile_context>

<pallas_src>
import jax
import jax.numpy as jnp
from jax import lax
from jax.experimental import pallas as pl
from jax.experimental.pallas import tpu as pltpu

_MIB = 1024 * 1024


def _round_up(x, m):
    return -(-x // m) * m


def _vmem_capacity_bytes():
    """Physical per-core VMEM (128 MiB on v5e/v6e, 64 MiB per TC on v7x)."""
    try:
        info = pltpu.get_tpu_info()
        cap = int(getattr(info, "vmem_capacity_bytes", 128 * _MIB))
        if cap > 0:
            return cap
    except Exception:
        pass
    return 128 * _MIB


def _choose_tile(B, C, D, *, feat_itemsize, pmf_itemsize, vmem_budget_bytes,
                 feature_buffers=2):
    """Largest batch tile whose *padded* pipelined working set fits the VMEM
    budget.  Layout-aware: D rounds up to 128 lanes, C rounds up to 8
    sublanes, buffer count applied to the padded sizes.  Whole batch if it
    fits (full-dim blocks are always legal)."""
    d_pad = _round_up(D, 128)                       # lane padding of (TB, D)
    c_pad = _round_up(max(C, 1), 8)                 # sublane padding of (C, TB)
    bytes_per_row = (2 * feature_buffers * d_pad * feat_itemsize   # g + d
                     + 2 * 2 * c_pad * pmf_itemsize)               # pmf + target
    if B * bytes_per_row <= vmem_budget_bytes:
        return int(B)
    tb_budget = (vmem_budget_bytes // max(bytes_per_row, 1)) // 128 * 128
    # DMA-size-aware soft cap: aim for >= ~2 MiB per feature stream per step
    # when D is small, but bound at 4096 to keep the (TB,1) cosine epilogue's
    # vreg pressure / EUP pushes from becoming the exposed cost.
    tb_for_dma = _round_up(max(1, -(-(2 * _MIB) // (d_pad * feat_itemsize))), 128)
    cap = min(4096, max(1024, tb_for_dma))
    tb = max(128, min(cap, tb_budget))
    # TODO(synk): tile the feature dim D as well for extremely wide features
    # (single padded row exceeding the VMEM budget).
    return int(tb)


def _make_loss_kernel(*, B, C, TB, SPC, needs_mask, weights, feats_w):
    # Fold the per-class BCE weight and the 1/B of the batch mean into one
    # Python float per class (and feats_w/B likewise) -> trace-time literals,
    # no captured array constants.
    wb = [float(w) / float(B) for w in weights]
    cw = float(feats_w) / float(B)

    def kernel(pmf_ref, tgt_ref, gen_ref, del_ref, o_ref):
        s = pl.program_id(1)

        @pl.when(s == 0)
        def _init():
            o_ref[...] = jnp.zeros_like(o_ref)

        # Upcast to f32 in-register (no-op for f32 inputs, supports bf16 HBM).
        p = pmf_ref[...].astype(jnp.float32)      # (C, TB)  batch on lanes
        y = tgt_ref[...].astype(jnp.float32)      # (C, TB)
        g = gen_ref[...].astype(jnp.float32)      # (TB, D)
        d = del_ref[...].astype(jnp.float32)      # (TB, D)

        # ---- weighted per-class BCE (PyTorch log clamp at -100) -----------
        log_p = jnp.maximum(jnp.log(p), -100.0)
        log_1mp = jnp.maximum(jnp.log(1.0 - p), -100.0)
        bce = -(y * log_p + (1.0 - y) * log_1mp)  # (C, TB)
        wsum = wb[0] * bce[0:1, :]                # (1, TB), weights folded
        for i in range(1, C):
            wsum = wsum + wb[i] * bce[i:i + 1, :]

        # ---- cosine similarity along feature dim ---------------------------
        dot = jnp.sum(g * d, axis=1, keepdims=True)   # (TB, 1)
        ng2 = jnp.sum(g * g, axis=1, keepdims=True)
        nd2 = jnp.sum(d * d, axis=1, keepdims=True)
        # single EUP rsqrt instead of two sqrt pushes + a VALU divide
        cos = dot * lax.rsqrt(jnp.maximum(ng2 * nd2, 1e-16))

        if needs_mask:
            # Rows past B (padded trailing tile / over-covered core split)
            # must not contribute to either mean.  Keep this a select: the
            # discarded branch may hold NaN/Inf from OOB garbage.
            base = (pl.program_id(0) * SPC + s) * TB
            lane = lax.broadcasted_iota(jnp.int32, (1, TB), 1)
            wsum = jnp.where(base + lane < B, wsum, 0.0)
            row = lax.broadcasted_iota(jnp.int32, (TB, 1), 0)
            cos = jnp.where(base + row < B, cos, 0.0)

        partial = jnp.sum(wsum) + cw * jnp.sum(cos)
        # Accumulate into the resident lane-dense output block; Pallas writes
        # it back to HBM only once per core (when the block index changes).
        o_ref[...] += partial

    return kernel


def loss_pallas(pmf, target, feat_general, feat_delam, weights, feats_w, *,
                tile_b=None, num_core_splits=None, vmem_limit_bytes=None,
                feature_buffers=2, cast_features_to=None):
    """Pallas TPU loss.

    NOTE: for tiny problems (a few KiB of data, like the demo below) the fused
    XLA graph in `loss_ref` is faster than any standalone pallas_call; this
    kernel targets large B*D.  `cast_features_to=jnp.bfloat16` halves the
    dominant HBM traffic (kernel math stays f32)."""
    B, C = pmf.shape
    Bf, D = feat_general.shape
    assert Bf == B and feat_delam.shape == (B, D)
    assert len(weights) == C

    if cast_features_to is not None:
        feat_general = feat_general.astype(cast_features_to)
        feat_delam = feat_delam.astype(cast_features_to)

    # ---- generation-aware VMEM budget & core split -------------------------
    vmem_cap = _vmem_capacity_bytes()
    if vmem_cap >= 128 * _MIB:        # v5e / v6e: 1 TensorCore, 128 MiB VMEM
        default_nc, tile_budget, default_limit = 1, 48 * _MIB, 64 * _MIB
    else:                             # v7x-class: 2 TensorCores, 64 MiB/TC
        default_nc, tile_budget, default_limit = 2, 24 * _MIB, 32 * _MIB
    if vmem_limit_bytes is None:
        vmem_limit_bytes = default_limit

    feat_itemsize = jnp.dtype(feat_general.dtype).itemsize
    pmf_itemsize = jnp.dtype(pmf.dtype).itemsize

    if tile_b is None:
        TB = _choose_tile(B, C, D, feat_itemsize=feat_itemsize,
                          pmf_itemsize=pmf_itemsize,
                          vmem_budget_bytes=tile_budget,
                          feature_buffers=feature_buffers)
    else:
        # Validate/round a user tile: partial blocks must be multiples of 128.
        TB = int(tile_b)
        if TB >= B:
            TB = int(B)
        else:
            TB = max(128, (TB // 128) * 128)

    num_tiles = pl.cdiv(B, TB)
    NC_req = default_nc if num_core_splits is None else int(num_core_splits)
    NC = max(1, min(NC_req, num_tiles))          # megacore split (v7x only)
    SPC = pl.cdiv(num_tiles, NC)                 # tiles per core
    needs_mask = (num_tiles * TB != B) or (NC * SPC != num_tiles)

    if NC * SPC == num_tiles:
        def tile_idx(c, s):
            return c * SPC + s
    else:
        # Over-covered split: clamp the DMA'd block in-bounds; the in-kernel
        # mask (computed from the *unclamped* index) zeroes its contribution.
        def tile_idx(c, s):
            return jnp.minimum(c * SPC + s, num_tiles - 1)

    # Lane-dense layout for the tiny (B, 3) tensors: (C, B) puts the batch on
    # the 128-lane axis -> dense vregs and unmasked contiguous DMA rows.
    pmf_t = jnp.transpose(pmf)
    tgt_t = jnp.transpose(target)

    kernel = _make_loss_kernel(B=B, C=C, TB=TB, SPC=SPC, needs_mask=needs_mask,
                               weights=weights, feats_w=feats_w)

    def _feat_spec():
        if feature_buffers > 2:
            # 3-deep pipelining for the dominant streams (v7x, if DMA exposed).
            return pl.BlockSpec((TB, D), lambda c, s: (tile_idx(c, s), 0),
                                pipeline_mode=pl.Buffered(feature_buffers))
        return pl.BlockSpec((TB, D), lambda c, s: (tile_idx(c, s), 0))

    partials = pl.pallas_call(
        kernel,
        out_shape=jax.ShapeDtypeStruct((1, NC * 128), jnp.float32),
        grid=(NC, SPC),
        in_specs=[
            pl.BlockSpec((C, TB), lambda c, s: (0, tile_idx(c, s))),   # pmf^T
            pl.BlockSpec((C, TB), lambda c, s: (0, tile_idx(c, s))),   # target^T
            _feat_spec(),                                              # general
            _feat_spec(),                                              # delam
        ],
        out_specs=pl.BlockSpec((1, 128), lambda c, s: (0, c)),
        compiler_params=pltpu.CompilerParams(
            dimension_semantics=("parallel", "arbitrary"),
            vmem_limit_bytes=vmem_limit_bytes),
    )(pmf_t, tgt_t, feat_general, feat_delam)

    # Each core's (1, 128) block holds its partial sum broadcast across lanes.
    return jnp.sum(partials.reshape(NC, 128)[:, 0])


def loss_ref(pmf, target, feat_general, feat_delam, weights, feats_w):
    """Pure-JAX reference mirroring the PyTorch module."""
    log_p = jnp.maximum(jnp.log(pmf), -100.0)
    log_1mp = jnp.maximum(jnp.log(1.0 - pmf), -100.0)
    bce_elem = -(target * log_p + (1.0 - target) * log_1mp)     # (B, C)
    bce_per_class = jnp.mean(bce_elem, axis=0)                  # (C,)
    out = jnp.sum(jnp.asarray(weights, jnp.float32) * bce_per_class)
    dot = jnp.sum(feat_general * feat_delam, axis=1)
    ng = jnp.linalg.norm(feat_general, axis=1)
    nd = jnp.linalg.norm(feat_delam, axis=1)
    cos = dot / jnp.maximum(ng * nd, 1e-8)
    return out + feats_w * jnp.mean(cos)


if __name__ == "__main__":
    # params string of the original module, e.g. "1.0_0.5_2.0_0.25"
    params = "1.0_0.5_2.0_0.25"
    w = params.split("_")
    weights = [float(wi) for wi in w[:3]]
    feats_w = float(w[3])

    # --- small demo shape (C = 3 pmf heads is fixed by the module) ---------
    B, C, D = 8, 3, 32
    key = jax.random.PRNGKey(0)
    k1, k2, k3, k4 = jax.random.split(key, 4)
    pmf = jax.nn.sigmoid(jax.random.normal(k1, (B, C), dtype=jnp.float32))
    target = jax.random.bernoulli(k2, 0.5, (B, C)).astype(jnp.float32)
    feat_general = jax.random.normal(k3, (B, D), dtype=jnp.float32)
    feat_delam = jax.random.normal(k4, (B, D), dtype=jnp.float32)

    out = loss_pallas(pmf, target, feat_general, feat_delam, weights, feats_w)
    out = jax.block_until_ready(out)
    ref = loss_ref(pmf, target, feat_general, feat_delam, weights, feats_w)
    assert jnp.allclose(out, ref, rtol=1e-4, atol=1e-4), (out, ref)

    # --- larger batch: default auto-tile (full batch fits VMEM) ------------
    B2, D2 = 600, 64
    k1, k2, k3, k4 = jax.random.split(jax.random.PRNGKey(1), 4)
    pmf2 = jax.nn.sigmoid(jax.random.normal(k1, (B2, C), dtype=jnp.float32))
    target2 = jax.random.bernoulli(k2, 0.5, (B2, C)).astype(jnp.float32)
    g2 = jax.random.normal(k3, (B2, D2), dtype=jnp.float32)
    d2 = jax.random.normal(k4, (B2, D2), dtype=jnp.float32)

    out2 = loss_pallas(pmf2, target2, g2, d2, weights, feats_w)
    out2 = jax.block_until_ready(out2)
    ref2 = loss_ref(pmf2, target2, g2, d2, weights, feats_w)
    assert jnp.allclose(out2, ref2, rtol=1e-4, atol=1e-4), (out2, ref2)

    # --- forced tiled + masked + over-covered 2-way core-split path --------
    # tile_b=200 exercises the rounding guard (-> 128), 600/128 = 5 tiles,
    # NC=2 / SPC=3 over-covers by one phantom step (masked out in-kernel).
    out3 = loss_pallas(pmf2, target2, g2, d2, weights, feats_w,
                       tile_b=200, num_core_splits=2)
    out3 = jax.block_until_ready(out3)
    assert jnp.allclose(out3, ref2, rtol=1e-4, atol=1e-4), (out3, ref2)

    # --- bf16 feature streams (halved HBM traffic), f32 math in-kernel -----
    out4 = loss_pallas(pmf2, target2, g2, d2, weights, feats_w,
                       cast_features_to=jnp.bfloat16)
    out4 = jax.block_until_ready(out4)
    ref4 = loss_ref(pmf2, target2,
                    g2.astype(jnp.bfloat16).astype(jnp.float32),
                    d2.astype(jnp.bfloat16).astype(jnp.float32),
                    weights, feats_w)
    assert jnp.allclose(out4, ref4, rtol=1e-3, atol=1e-3), (out4, ref4)

    print("KERNEL_OK")
</pallas_src>

<mosaic_0001>
module attributes {stable_mosaic.version = 11 : i64} {
  func.func @kernel(%arg0: i32, %arg1: i32, %arg2: memref<3x8xf32, #tpu.memory_space<vmem>>, %arg3: memref<3x8xf32, #tpu.memory_space<vmem>>, %arg4: memref<8x32xf32, #tpu.memory_space<vmem>>, %arg5: memref<8x32xf32, #tpu.memory_space<vmem>>, %arg6: memref<1x128xf32, #tpu.memory_space<vmem>>) attributes {dimension_semantics = [#tpu.dimension_semantics<parallel>, #tpu.dimension_semantics<arbitrary>], iteration_bounds = array<i64: 1, 1>, scalar_prefetch = 0 : i64, scratch_operands = 0 : i64, tpu.core_type = #tpu.core_type<tc>, window_params = [{transform_indices = @transform_0, window_bounds = array<i64: 3, 8>}, {transform_indices = @transform_1, window_bounds = array<i64: 3, 8>}, {transform_indices = @transform_2, window_bounds = array<i64: 8, 32>}, {transform_indices = @transform_3, window_bounds = array<i64: 8, 32>}, {transform_indices = @transform_4, window_bounds = array<i64: 1, 128>}]} {
    %c0_i32 = arith.constant 0 : i32
    %0 = arith.cmpi eq, %arg1, %c0_i32 : i32
    %1 = arith.extui %0 : i1 to i32
    %c0_i32_0 = arith.constant 0 : i32
    %2 = arith.cmpi ne, %1, %c0_i32_0 : i32
    scf.if %2 {
      %cst_26 = arith.constant 0.000000e+00 : f32
      %61 = vector.broadcast %cst_26 : f32 to vector<1x128xf32>
      %c0_27 = arith.constant 0 : index
      %c0_28 = arith.constant 0 : index
      %62 = vector.load %arg6[%c0_27, %c0_28] : memref<1x128xf32, #tpu.memory_space<vmem>>, vector<1x128xf32>
      tpu.vector_store %arg6[%c0_27, %c0_28], %61 {strides = array<i32>} : memref<1x128xf32, #tpu.memory_space<vmem>>, vector<1x128xf32>,
    } else {
    }
    %c0 = arith.constant 0 : index
    %c0_1 = arith.constant 0 : index
    %3 = vector.load %arg2[%c0, %c0_1] : memref<3x8xf32, #tpu.memory_space<vmem>>, vector<3x8xf32>
    %c0_2 = arith.constant 0 : index
    %c0_3 = arith.constant 0 : index
    %4 = vector.load %arg3[%c0_2, %c0_3] : memref<3x8xf32, #tpu.memory_space<vmem>>, vector<3x8xf32>
    %c0_4 = arith.constant 0 : index
    %c0_5 = arith.constant 0 : index
    %5 = vector.load %arg4[%c0_4, %c0_5] : memref<8x32xf32, #tpu.memory_space<vmem>>, vector<8x32xf32>
    %c0_6 = arith.constant 0 : index
    %c0_7 = arith.constant 0 : index
    %6 = vector.load %arg5[%c0_6, %c0_7] : memref<8x32xf32, #tpu.memory_space<vmem>>, vector<8x32xf32>
    %7 = math.log %3 : vector<3x8xf32>
    %cst = arith.constant -1.000000e+02 : f32
    %8 = vector.broadcast %cst : f32 to vector<3x8xf32>
    %9 = arith.maximumf %7, %8 : vector<3x8xf32>
    %cst_8 = arith.constant 1.000000e+00 : f32
    %10 = vector.broadcast %cst_8 : f32 to vector<3x8xf32>
    %11 = arith.subf %10, %3 : vector<3x8xf32>
    %12 = math.log %11 : vector<3x8xf32>
    %cst_9 = arith.constant -1.000000e+02 : f32
    %13 = vector.broadcast %cst_9 : f32 to vector<3x8xf32>
    %14 = arith.maximumf %12, %13 : vector<3x8xf32>
    %15 = arith.mulf %4, %9 : vector<3x8xf32>
    %cst_10 = arith.constant 1.000000e+00 : f32
    %16 = vector.broadcast %cst_10 : f32 to vector<3x8xf32>
    %17 = arith.subf %16, %4 : vector<3x8xf32>
    %18 = arith.mulf %17, %14 : vector<3x8xf32>
    %19 = arith.addf %15, %18 : vector<3x8xf32>
    %cst_11 = arith.constant 0.000000e+00 : f32
    %20 = vector.broadcast %cst_11 : f32 to vector<3x8xf32>
    %21 = arith.subf %20, %19 : vector<3x8xf32>
    %22 = vector.extract_strided_slice %21 {offsets = [0, 0], sizes = [1, 8], strides = [1, 1]} : vector<3x8xf32> to vector<1x8xf32>
    %cst_12 = arith.constant 1.250000e-01 : f32
    %23 = vector.broadcast %cst_12 : f32 to vector<1x8xf32>
    %24 = arith.mulf %23, %22 : vector<1x8xf32>
    %25 = vector.extract_strided_slice %21 {offsets = [1, 0], sizes = [1, 8], strides = [1, 1]} : vector<3x8xf32> to vector<1x8xf32>
    %cst_13 = arith.constant 6.250000e-02 : f32
    %26 = vector.broadcast %cst_13 : f32 to vector<1x8xf32>
    %27 = arith.mulf %26, %25 : vector<1x8xf32>
    %28 = arith.addf %24, %27 : vector<1x8xf32>
    %29 = vector.extract_strided_slice %21 {offsets = [2, 0], sizes = [1, 8], strides = [1, 1]} : vector<3x8xf32> to vector<1x8xf32>
    %cst_14 = arith.constant 2.500000e-01 : f32
    %30 = vector.broadcast %cst_14 : f32 to vector<1x8xf32>
    %31 = arith.mulf %30, %29 : vector<1x8xf32>
    %32 = arith.addf %28, %31 : vector<1x8xf32>
    %33 = arith.mulf %5, %6 : vector<8x32xf32>
    %cst_15 = arith.constant dense<0.000000e+00> : vector<8xf32>
    %34 = vector.multi_reduction <add>, %33, %cst_15 [1] : vector<8x32xf32> to vector<8xf32>
    %35 = vector.shape_cast %34 : vector<8xf32> to vector<8x1xf32>
    %36 = arith.mulf %5, %5 : vector<8x32xf32>
    %cst_16 = arith.constant dense<0.000000e+00> : vector<8xf32>
    %37 = vector.multi_reduction <add>, %36, %cst_16 [1] : vector<8x32xf32> to vector<8xf32>
    %38 = vector.shape_cast %37 : vector<8xf32> to vector<8x1xf32>
    %39 = arith.mulf %6, %6 : vector<8x32xf32>
    %cst_17 = arith.constant dense<0.000000e+00> : vector<8xf32>
    %40 = vector.multi_reduction <add>, %39, %cst_17 [1] : vector<8x32xf32> to vector<8xf32>
    %41 = vector.shape_cast %40 : vector<8xf32> to vector<8x1xf32>
    %42 = arith.mulf %38, %41 : vector<8x1xf32>
    %cst_18 = arith.constant 1.000000e-16 : f32
    %43 = vector.broadcast %cst_18 : f32 to vector<8x1xf32>
    %44 = arith.maximumf %42, %43 : vector<8x1xf32>
    %45 = math.rsqrt %44 : vector<8x1xf32>
    %46 = arith.mulf %35, %45 : vector<8x1xf32>
    %47 = vector.shape_cast %32 : vector<1x8xf32> to vector<1x1x8xf32>
    %cst_19 = arith.constant dense<0.000000e+00> : vector<1xf32>
    %48 = vector.multi_reduction <add>, %47, %cst_19 [1, 2] : vector<1x1x8xf32> to vector<1xf32>
    %49 = vector.shape_cast %48 : vector<1xf32> to vector<1x1x1xf32>
    %50 = vector.extract %49[0, 0, 0] : f32 from vector<1x1x1xf32>
    %51 = vector.shape_cast %46 : vector<8x1xf32> to vector<1x8x1xf32>
    %cst_20 = arith.constant dense<0.000000e+00> : vector<1xf32>
    %52 = vector.multi_reduction <add>, %51, %cst_20 [1, 2] : vector<1x8x1xf32> to vector<1xf32>
    %53 = vector.shape_cast %52 : vector<1xf32> to vector<1x1x1xf32>
    %54 = vector.extract %53[0, 0, 0] : f32 from vector<1x1x1xf32>
    %cst_21 = arith.constant 3.125000e-02 : f32
    %55 = arith.mulf %cst_21, %54 : f32
    %56 = arith.addf %50, %55 : f32
    %c0_22 = arith.constant 0 : index
    %c0_23 = arith.constant 0 : index
    %57 = vector.load %arg6[%c0_22, %c0_23] : memref<1x128xf32, #tpu.memory_space<vmem>>, vector<1x128xf32>
    %58 = vector.broadcast %56 : f32 to vector<1x128xf32>
    %59 = arith.addf %57, %58 : vector<1x128xf32>
    %c0_24 = arith.constant 0 : index
    %c0_25 = arith.constant 0 : index
    %60 = vector.load %arg6[%c0_24, %c0_25] : memref<1x128xf32, #tpu.memory_space<vmem>>, vector<1x128xf32>
    tpu.vector_store %arg6[%c0_24, %c0_25], %59 {strides = array<i32>} : memref<1x128xf32, #tpu.memory_space<vmem>>, vector<1x128xf32>,
    return
  }
  func.func @transform_0(%arg0: i32, %arg1: i32) -> (i32, i32) {
    %c1_i32 = arith.constant 1 : i32
    %0 = arith.muli %arg0, %c1_i32 : i32
    %1 = arith.addi %0, %arg1 : i32
    %c0_i32 = arith.constant 0 : i32
    %c0_i32_0 = arith.constant 0 : i32
    return %c0_i32, %1 : i32, i32
  }
  func.func @transform_1(%arg0: i32, %arg1: i32) -> (i32, i32) {
    %c1_i32 = arith.constant 1 : i32
    %0 = arith.muli %arg0, %c1_i32 : i32
    %1 = arith.addi %0, %arg1 : i32
    %c0_i32 = arith.constant 0 : i32
    %c0_i32_0 = arith.constant 0 : i32
    return %c0_i32, %1 : i32, i32
  }
  func.func @transform_2(%arg0: i32, %arg1: i32) -> (i32, i32) {
    %c1_i32 = arith.constant 1 : i32
    %0 = arith.muli %arg0, %c1_i32 : i32
    %1 = arith.addi %0, %arg1 : i32
    %c0_i32 = arith.constant 0 : i32
    %c0_i32_0 = arith.constant 0 : i32
    return %1, %c0_i32 : i32, i32
  }
  func.func @transform_3(%arg0: i32, %arg1: i32) -> (i32, i32) {
    %c1_i32 = arith.constant 1 : i32
    %0 = arith.muli %arg0, %c1_i32 : i32
    %1 = arith.addi %0, %arg1 : i32
    %c0_i32 = arith.constant 0 : i32
    %c0_i32_0 = arith.constant 0 : i32
    return %1, %c0_i32 : i32, i32
  }
  func.func @transform_4(%arg0: i32, %arg1: i32) -> (i32, i32) {
    %c0_i32 = arith.constant 0 : i32
    %c0_i32_0 = arith.constant 0 : i32
    return %c0_i32, %arg0 : i32, i32
  }
}

</mosaic_0001>

<bundles_post_ra>
// kernel: tpu_custom_call.1
= control target key start
LH: loop header
LB: loop body
LE: loop exit
PB: predicated region body
PF: predicated region fallthrough
CT: control target
= control target key end

     0   :  { %9 = vsyncpa [#allocation3], 0  ;;  %s400_s0 = inlined_call_operand.hbm [shape: f32[3,8], index: 0, kind: input, shape index: {}]   ;;  %s401_s1 = inlined_call_operand.hbm [shape: f32[3,8], index: 1, kind: input, shape index: {}]   ;;  %s402_s2 = inlined_call_operand.hbm [shape: f32[8,32], index: 2, kind: input, shape index: {}]   ;;  %s403_s3 = inlined_call_operand.hbm [shape: f32[8,32], index: 3, kind: input, shape index: {}]   ;;  %s404_s4 = inlined_call_operand.hbm [shape: f32[1,128], index: 4, kind: output, shape index: {}]  }
   0x1   :  { %10 = vsyncpa [#allocation6], 0 }
   0x2   :  { %11 = vsyncpa [#allocation9], 0 }
   0x3   :  { %12 = vsyncpa [#allocation4], 0  ;;  %s309_s15 = smov [#allocation5]   ;;  %s310_s17 = smov [#allocation2]  }
   0x4   :  { %s35_s16 = sshll.u32 %s309_s15, 4  ;;  %s22_s18 = sshll.u32 %s310_s17, 4  ;;  %s36_s16 = int_to_ptr.vmem [resolvable:$true] %s35_s16  ;;  %s23_s18 = int_to_ptr.vmem [resolvable:$true] %s22_s18 }
   0x5   :  { %s191_s21 = scalar_lea.hbm %s401_s1, 64 }
   0x6   :  { %p192_p0 = scmp.ne.s32.totalorder %s401_s1, %s191_s21  ;;  %p195_p1 = scmp.lt.u32.totalorder %s191_s21, %s401_s1 }
   0x8   :  { %p197_p2 = pnand %p195_p1, %p192_p0 }
   0xa   :  { %200 = shalt.err (!%p197_p2)
}
   0xb   :  { %s201_s26 = scalar_lea.vmem %s36_s16, 64  ;;  %p206_p4 = scmp.lt.s32.totalorder %s36_s16, %s36_s16 }
   0xc   :  { %p202_p3 = scmp.ne.s32.totalorder %s36_s16, %s201_s26  ;;  %p207_p5 = scmp.lt.s32.totalorder %s201_s26, %s201_s26 }
   0xe   :  { %p208_p6 = por %p207_p5, %p206_p4 }
  0x10   :  { %p209_p7 = pnand %p208_p6, %p202_p3 }
  0x12   :  { %212 = shalt.err (!%p209_p7)
}
  0x13   :  { %38 = dma.hbm_to_vmem [thread:$0]  %s401_s1, 64, %s36_s16, [#allocation6]  }
  0x14   :  { %s213_s5 = scalar_lea.hbm %s400_s0, 64 }
  0x15   :  { %p214_p8 = scmp.ne.s32.totalorder %s400_s0, %s213_s5  ;;  %p217_p9 = scmp.lt.u32.totalorder %s213_s5, %s400_s0 }
  0x17   :  { %p219_p10 = pnand %p217_p9, %p214_p8 }
  0x19   :  { %222 = shalt.err (!%p219_p10)
}
  0x1a   :  { %s223_s10 = scalar_lea.vmem %s23_s18, 64  ;;  %p228_p12 = scmp.lt.s32.totalorder %s23_s18, %s23_s18 }
  0x1b   :  { %p224_p11 = scmp.ne.s32.totalorder %s23_s18, %s223_s10  ;;  %p229_p13 = scmp.lt.s32.totalorder %s223_s10, %s223_s10 }
  0x1d   :  { %p230_p0 = por %p229_p13, %p228_p12 }
  0x1f   :  { %p231_p1 = pnand %p230_p0, %p224_p11 }
  0x21   :  { %234 = shalt.err (!%p231_p1)
}
  0x22   :  { %25 = dma.hbm_to_vmem [thread:$0]  %s400_s0, 64, %s23_s18, [#allocation3]  }
  0x23   :  { %s311_s12 = smov [#allocation7]   ;;  %s312_s14 = smov [#allocation8]  }
  0x24   :  { %s48_s13 = sshll.u32 %s311_s12, 4  ;;  %s61_s15 = sshll.u32 %s312_s14, 4  ;;  %s49_s13 = int_to_ptr.vmem [resolvable:$true] %s48_s13  ;;  %s62_s15 = int_to_ptr.vmem [resolvable:$true] %s61_s15 }
  0x25   :  { %s235_s19 = scalar_lea.hbm %s402_s2, 128 }
  0x26   :  { %p236_p2 = scmp.ne.s32.totalorder %s402_s2, %s235_s19  ;;  %p239_p3 = scmp.lt.u32.totalorder %s235_s19, %s402_s2 }
  0x28   :  { %p241_p4 = pnand %p239_p3, %p236_p2 }
  0x2a   :  { %244 = shalt.err (!%p241_p4)
}
  0x2b   :  { %s245_s0 = scalar_lea.vmem %s49_s13, 128  ;;  %p250_p6 = scmp.lt.s32.totalorder %s49_s13, %s49_s13 }
  0x2c   :  { %p246_p5 = scmp.ne.s32.totalorder %s49_s13, %s245_s0  ;;  %p251_p7 = scmp.lt.s32.totalorder %s245_s0, %s245_s0 }
  0x2e   :  { %p252_p8 = por %p251_p7, %p250_p6 }
  0x30   :  { %p253_p9 = pnand %p252_p8, %p246_p5 }
  0x32   :  { %256 = shalt.err (!%p253_p9)
}
  0x33   :  { %51 = dma.hbm_to_vmem [thread:$0]  %s402_s2, 128, %s49_s13, [#allocation6]  }
  0x34   :  { %s257_s27 = scalar_lea.hbm %s403_s3, 128 }
  0x35   :  { %p258_p10 = scmp.ne.s32.totalorder %s403_s3, %s257_s27  ;;  %p261_p11 = scmp.lt.u32.totalorder %s257_s27, %s403_s3 }
  0x37   :  { %p263_p12 = pnand %p261_p11, %p258_p10 }
  0x39   :  { %266 = shalt.err (!%p263_p12)
}
  0x3a   :  { %s267_s6 = scalar_lea.vmem %s62_s15, 128  ;;  %p272_p0 = scmp.lt.s32.totalorder %s62_s15, %s62_s15 }
  0x3b   :  { %p268_p13 = scmp.ne.s32.totalorder %s62_s15, %s267_s6  ;;  %p273_p1 = scmp.lt.s32.totalorder %s267_s6, %s267_s6 }
  0x3d   :  { %p274_p2 = por %p273_p1, %p272_p0 }
  0x3f   :  { %p275_p3 = pnand %p274_p2, %p268_p13 }
  0x41   :  { %278 = shalt.err (!%p275_p3)
}
  0x42   :  { %64 = dma.hbm_to_vmem [thread:$0]  %s403_s3, 128, %s62_s15, [#allocation9]  }
  0x43   :  { %301 = dma.done.wait [#allocation3], 64  }
  0x44   :  { %302 = vsyncadd [#allocation3], 4294967232 }
  0x45   :  { %303 = dma.done.wait [#allocation6], 192  }
  0x46   :  { %304 = vsyncadd [#allocation6], 4294967104 }
  0x47   :  { %305 = dma.done.wait [#allocation9], 128  }
  0x48   :  { %306 = vsyncadd [#allocation9], 4294967168  ;;  %v313_v0 = vmov 0.0   ;;  %v88_v1 = vld [vmem:[#allocation7] sm:$0xff]  ;;  %vm114_vm0 = vcmask 261120   ;;  %v89_v2 = vld [vmem:[#allocation8] sm:$0xff] }
  0x49   :  { %85 = vst [vmem:[#allocation10] sm:$0x1] %v313_v0  ;;  %v118_v3 = vmul.f32 %v88_v1, %v88_v1  ;;  %v122_v4 = vmul.f32 %v89_v2, %v89_v2  ;;  %v113_v5 = vmul.f32 %v89_v2, %v88_v1  ;;  %v86_v6 = vld [vmem:[#allocation2] sm:$0x7]  ;;  %v87_v14 = vld [vmem:[#allocation5] sm:$0x7] }
  0x4a   :  { %v93_v7 = vsub.f32 1.0, %v86_v6  ;;  %185 = vlog2.f32 %v86_v6  ;;  %v98_v17 = vsub.f32 1.0, %v87_v14  ;;  %vm130_vm1 = vcmask 57344   ;;  %s314_s1 = smov [#allocation10]  }
  0x4b   :  { %v119_v8 = vsel %vm114_vm0, %v118_v3, 0.0  ;;  %v115_v9 = vsel %vm114_vm0, %v113_v5, 0.0  ;;  %v123_v10 = vsel %vm114_vm0, %v122_v4, 0.0  ;;  %vm141_vm2 = vcmask 7168   ;;  %s164_s11 = sshll.u32 %s314_s1, 4  ;;  %s165_s11 = int_to_ptr.vmem [resolvable:$true] %s164_s11 }
  0x4c   :  { %120 = vadd.xlane.f32.xlu0 %v119_v8  ;;  %116 = vadd.xlane.f32.xlu1 %v115_v9  ;;  %187 = vlog2.f32 %v93_v7  ;;  %s279_s12 = scalar_lea.vmem %s165_s11, 16  ;;  %s283_s13 = scalar_lea.vmem %s165_s11, 32 }
  0x4d   :  { %p280_p4 = scmp.ne.s32.totalorder %s165_s11, %s279_s12  ;;  %p284_p5 = scmp.lt.s32.totalorder %s165_s11, %s165_s11 }
  0x4e   :  { %p285_p6 = scmp.lt.s32.totalorder %s283_s13, %s279_s12 }
  0x50   :  { %124 = vadd.xlane.f32.xlu0 %v123_v10  ;;  %v154_v53 = vld [vmem:[#allocation10] sm:$0x1]  ;;  %p286_p7 = por %p285_p6, %p284_p5 }
  0x52   :  { %p287_p8 = pnand %p286_p7, %p280_p4 }
  0x54   :  { %v186_v11 = vpop.eup %185 }
  0x55   :  { %v91_v13 = vmul.f32 0.6931472, %v186_v11 }
  0x56   :  { %v188_v12 = vpop.eup %187 }
  0x57   :  { %v95_v15 = vmul.f32 0.6931472, %v188_v12  ;;  %v92_v16 = vmax.f32 %v91_v13, -100.0 }
  0x59   :  { %v96_v18 = vmax.f32 %v95_v15, -100.0  ;;  %v97_v19 = vmul.f32 %v92_v16, %v87_v14 }
  0x5b   :  { %v99_v20 = vmul.f32 %v98_v17, %v96_v18 }
  0x5d   :  { %v100_v21 = vadd.f32 %v99_v20, %v97_v19 }
  0x5f   :  { %v101_v22 = vsub.f32 0.0, %v100_v21 }
  0x61   :  { %v102_v23 = vmul.f32 0.125, %v101_v22  ;;  %v103_v24 = vmul.f32 0.0625, %v101_v22  ;;  %v108_v25 = vmul.f32 0.25, %v101_v22 }
  0x63   :  { %v105_v26 = vrot.slane %v103_v24, 1  ;;  %v110_v27 = vrot.slane %v108_v25, 2 }
  0x65   :  { %v107_v28 = vadd.f32 %v105_v26, %v102_v23 }
  0x67   :  { %v112_v29 = vadd.f32 %v110_v27, %v107_v28 }
  0x69   :  { %v131_v30 = vsel %vm130_vm1, %v112_v29, 0.0 }
  0x6a   :  { %132 = vadd.xlane.f32.xlu1 %v131_v30 }
  0xd9   :  { %v121_v31 = vpop.xlane.xlu0 %120  ;;  %v117_v35 = vpop.xlane.xlu1 %116 }
  0xdd   :  { %v125_v32 = vpop.xlane.xlu0 %124 }
  0xde   :  { %v126_v33 = vmul.f32 %v125_v32, %v121_v31 }
  0xe0   :  { %v127_v34 = vmax.f32 %v126_v33, 1e-16 }
  0xe2   :  { %189 = vrsqrt.f32 %v127_v34 }
  0xec   :  { %v190_v36 = vpop.eup %189 }
  0xed   :  { %v129_v37 = vmul.f32 %v190_v36, %v117_v35 }
  0xef   :  { %v142_v38 = vsel %vm141_vm2, %v129_v37, 0.0 }
  0xf0   :  { %143 = vadd.xlane.f32.xlu0 %v142_v38 }
  0xf7   :  { %v133_v39 = vpop.xlane.xlu1 %132 }
  0xf8   :  { %v134_v40 = vrot.slane %v133_v39, 4 }
  0xfa   :  { %v135_v41 = vadd.f32 %v134_v40, %v133_v39 }
  0xfc   :  { %v136_v42 = vrot.slane %v135_v41, 2 }
  0xfe   :  { %v137_v43 = vadd.f32 %v136_v42, %v135_v41 }
 0x100   :  { %v138_v44 = vrot.slane %v137_v43, 1 }
 0x102   :  { %v139_v45 = vadd.f32 %v138_v44, %v137_v43 }
 0x104   :  { %175 = vpush %v139_v45 }
 0x135   :  { %s176_s3 = spop %175 }
 0x17d   :  { %v144_v46 = vpop.xlane.xlu0 %143 }
 0x17e   :  { %v145_v47 = vrot.slane %v144_v46, 4 }
 0x180   :  { %v146_v48 = vadd.f32 %v145_v47, %v144_v46 }
 0x182   :  { %v147_v49 = vrot.slane %v146_v48, 2 }
 0x184   :  { %v148_v50 = vadd.f32 %v147_v49, %v146_v48 }
 0x186   :  { %v149_v51 = vrot.slane %v148_v50, 1 }
 0x188   :  { %v150_v52 = vadd.f32 %v149_v51, %v148_v50 }
 0x18a   :  { %177 = vpush %v150_v52 }
 0x1bb   :  { %s178_s8 = spop %177 }
 0x1bc   :  { %s152_s9 = smul.f32 0.03125, %s178_s8 }
 0x1be   :  { %s153_s10 = sadd.f32 %s176_s3, %s152_s9 }
 0x1c0   :  { %v155_v54 = vstv %s153_s10 }
 0x1c1   :  { %v156_v55 = vadd.f32 %v155_v54, %v154_v53 }
 0x1c3   :  { %157 = vst [vmem:[#allocation10] sm:$0x1] %v156_v55 }
 0x1c4   :  { %290 = shalt.err (!%p287_p8)
}
 0x1c5   :  { %s291_s16 = scalar_lea.hbm %s404_s4, 16 }
 0x1c6   :  { %p292_p9 = scmp.ne.s32.totalorder %s404_s4, %s291_s16  ;;  %p295_p10 = scmp.lt.u32.totalorder %s291_s16, %s404_s4 }
 0x1c8   :  { %p297_p11 = pnand %p295_p10, %p292_p9 }
 0x1ca   :  { %300 = shalt.err (!%p297_p11)
}
 0x1cb   :  { %167 = dma.vmem_to_hbm [thread:$0]  %s165_s11, 16, %s404_s4, [#allocation4]  }
 0x1cc   :  { %307 = dma.done.wait [#allocation4], 16  }
 0x1cd   :  { %308 = vsyncadd [#allocation4], 4294967280 }
 0x1ce   :  { %171 = vsyncpa [#allocation3], 1 }
 0x1cf   :  { %172 = vsyncpa [#allocation6], 1 }
 0x1d0   :  { %173 = vsyncpa [#allocation9], 1 }
 0x1d1   :  { %174 = vsyncpa [#allocation4], 1 }

</bundles_post_ra>
